<compile_context>
chip_gen: v7x
topology: tpu7x:2x2x1
jax: 0.10.0
libtpu: 0.0.40
codegen_flags: <defaults>
</compile_context>

<pallas_src>
import functools

import jax
import jax.numpy as jnp
from jax.experimental import pallas as pl
from jax.experimental.pallas import tpu as pltpu

# ---- module parameter (from __init__) --------------------------------------
P = 0.05

# ---- tiling -----------------------------------------------------------------
LANES = 128     # vreg lane width
MAX_BM = 2048   # max rows (of 128 nodes each) per grid step -> 256K nodes / step


def _node_drop_kernel(bits_ref, masks_ref, out_ref, *, threshold24):
    # 24-bit uniform integer per node (values in [0, 2^24)); sign-safe compare.
    bits24 = bits_ref[...] >> 8                               # (bm, 128) uint32
    keep = bits24 >= jnp.uint32(threshold24)                  # drop iff u < p
    m = masks_ref[...]                                        # (2, bm, 128) int8
    # Same per-node draw gates both masks (matches the PyTorch module).
    out_ref[...] = jnp.where(keep[None, :, :], m, jnp.zeros_like(m))


def node_drop(x, y, edge_index, train_mask, test_mask, seed, *, p=P):
    """Returns (x, y, edge_index, new_train_mask, new_test_mask)."""
    n = train_mask.shape[0]
    rows = pl.cdiv(n, LANES)

    if rows <= MAX_BM:
        # Single grid step, full-array block: tiling constraints waived, minimal padding.
        g, bm = 1, rows
    else:
        # Balanced tiles, 32-sublane aligned (int8 native tile), padding capped at a few rows.
        g = pl.cdiv(rows, MAX_BM)
        bm = ((pl.cdiv(rows, g) + 31) // 32) * 32
    rows_pad = g * bm
    n_pad = rows_pad * LANES

    # One int8 slab for both masks -> a single lane-dense DMA stream in / out.
    masks = jnp.stack([train_mask, test_mask]).astype(jnp.int8)           # (2, n)
    masks = jnp.pad(masks, ((0, 0), (0, n_pad - n))).reshape(2, rows_pad, LANES)

    # Per-node uniform bits (portable counter-based PRNG, deterministic per seed).
    bits = jax.random.bits(jax.random.PRNGKey(seed), (rows_pad, LANES), dtype=jnp.uint32)

    kernel = functools.partial(_node_drop_kernel, threshold24=int(p * (1 << 24)))

    new_masks = pl.pallas_call(
        kernel,
        out_shape=jax.ShapeDtypeStruct((2, rows_pad, LANES), jnp.int8),
        grid=(g,),
        in_specs=[
            pl.BlockSpec((bm, LANES), lambda i: (i, 0)),          # random bits
            pl.BlockSpec((2, bm, LANES), lambda i: (0, i, 0)),    # stacked masks
        ],
        out_specs=pl.BlockSpec((2, bm, LANES), lambda i: (0, i, 0)),
        input_output_aliases={1: 0},      # mask slab updated "in place"
        compiler_params=pltpu.CompilerParams(dimension_semantics=("parallel",)),
    )(bits, masks)

    flat = new_masks.reshape(2, n_pad)[:, :n]
    new_train = flat[0].astype(jnp.bool_)
    new_test = flat[1].astype(jnp.bool_)

    # x, y, edge_index are unchanged by NodeDrop -> pure pass-through.
    return x, y, edge_index, new_train, new_test


if __name__ == "__main__":
    key = jax.random.PRNGKey(0)
    n, d = 300, 16
    kx, ky, kt1, kt2 = jax.random.split(key, 4)

    x = jax.random.normal(kx, (n, d), dtype=jnp.float32)
    y = jax.random.randint(ky, (n,), 0, 7, dtype=jnp.int32)
    edge_index = jnp.stack([jnp.arange(n, dtype=jnp.int32),
                            jnp.roll(jnp.arange(n, dtype=jnp.int32), 1)])
    # Overlapping masks so the "same draw gates both masks" property is testable.
    train_mask = jax.random.bernoulli(kt1, 0.7, (n,))
    test_mask = jax.random.bernoulli(kt2, 0.7, (n,))

    seed = 1234
    out = node_drop(x, y, edge_index, train_mask, test_mask, seed)
    jax.block_until_ready(out)
    x_o, y_o, e_o, new_train, new_test = out

    # pass-through fields are unchanged
    assert x_o is x and y_o is y and e_o is edge_index

    # NodeDrop can only turn mask entries off, never on
    assert not bool(jnp.any(new_train & ~train_mask)), "train mask gained entries"
    assert not bool(jnp.any(new_test & ~test_mask)), "test mask gained entries"

    # the same per-node uniform draw gates both masks -> drops are consistent
    both = train_mask & test_mask
    assert bool(jnp.array_equal(jnp.where(both, new_train, False),
                                jnp.where(both, new_test, False))), \
        "train/test drops inconsistent"

    # loose sanity on the drop rate for p=0.05 (non-flaky bound)
    n_true = int(jnp.sum(train_mask))
    n_dropped = int(jnp.sum(train_mask & ~new_train))
    assert n_dropped <= max(1, n_true // 2), "drop rate implausibly high for p=0.05"

    # determinism: same seed -> identical masks
    out2 = node_drop(x, y, edge_index, train_mask, test_mask, seed)
    jax.block_until_ready(out2)
    assert bool(jnp.array_equal(new_train, out2[3]))
    assert bool(jnp.array_equal(new_test, out2[4]))

    print("KERNEL_OK")
</pallas_src>

<mosaic_0001>
module attributes {stable_mosaic.version = 11 : i64} {
  func.func @_node_drop_kernel(%arg0: i32, %arg1: memref<3x128xi32, #tpu.memory_space<vmem>>, %arg2: memref<2x3x128xi8, #tpu.memory_space<vmem>>, %arg3: memref<2x3x128xi8, #tpu.memory_space<vmem>>) attributes {dimension_semantics = [#tpu.dimension_semantics<parallel>], iteration_bounds = array<i64: 1>, scalar_prefetch = 0 : i64, scratch_operands = 0 : i64, tpu.core_type = #tpu.core_type<tc>, window_params = [{transform_indices = @transform_0, window_bounds = array<i64: 3, 128>}, {transform_indices = @transform_1, window_bounds = array<i64: 2, 3, 128>}, {transform_indices = @transform_2, window_bounds = array<i64: 2, 3, 128>}]} {
    %c0 = arith.constant 0 : index
    %c0_0 = arith.constant 0 : index
    %0 = vector.load %arg1[%c0, %c0_0] : memref<3x128xi32, #tpu.memory_space<vmem>>, vector<3x128xi32>
    %c8_i32 = arith.constant 8 : i32
    %1 = vector.broadcast %c8_i32 : i32 to vector<3x128xi32>
    %2 = arith.shrui %0, %1 : vector<3x128xi32>
    %c838860_i32 = arith.constant 838860 : i32
    %3 = vector.broadcast %c838860_i32 : i32 to vector<3x128xi32>
    %4 = arith.cmpi uge, %2, %3 : vector<3x128xi32>
    %c0_1 = arith.constant 0 : index
    %c0_2 = arith.constant 0 : index
    %c0_3 = arith.constant 0 : index
    %5 = vector.load %arg2[%c0_1, %c0_2, %c0_3] : memref<2x3x128xi8, #tpu.memory_space<vmem>>, vector<2x3x128xi8>
    %6 = vector.shape_cast %4 : vector<3x128xi1> to vector<1x3x128xi1>
    %c0_i8 = arith.constant 0 : i8
    %7 = vector.broadcast %c0_i8 : i8 to vector<2x3x128xi8>
    %8 = vector.shape_cast %6 : vector<1x3x128xi1> to vector<1x3x128xi1>
    %9 = vector.broadcast %8 : vector<1x3x128xi1> to vector<2x3x128xi1>
    %10 = arith.select %9, %5, %7 : vector<2x3x128xi1>, vector<2x3x128xi8>
    %c0_4 = arith.constant 0 : index
    %c0_5 = arith.constant 0 : index
    %c0_6 = arith.constant 0 : index
    %11 = vector.load %arg3[%c0_4, %c0_5, %c0_6] : memref<2x3x128xi8, #tpu.memory_space<vmem>>, vector<2x3x128xi8>
    tpu.vector_store %arg3[%c0_4, %c0_5, %c0_6], %10 {strides = array<i32>} : memref<2x3x128xi8, #tpu.memory_space<vmem>>, vector<2x3x128xi8>,
    return
  }
  func.func @transform_0(%arg0: i32) -> (i32, i32) {
    %c0_i32 = arith.constant 0 : i32
    %c0_i32_0 = arith.constant 0 : i32
    return %arg0, %c0_i32 : i32, i32
  }
  func.func @transform_1(%arg0: i32) -> (i32, i32, i32) {
    %c0_i32 = arith.constant 0 : i32
    %c0_i32_0 = arith.constant 0 : i32
    %c0_i32_1 = arith.constant 0 : i32
    return %c0_i32, %arg0, %c0_i32_0 : i32, i32, i32
  }
  func.func @transform_2(%arg0: i32) -> (i32, i32, i32) {
    %c0_i32 = arith.constant 0 : i32
    %c0_i32_0 = arith.constant 0 : i32
    %c0_i32_1 = arith.constant 0 : i32
    return %c0_i32, %arg0, %c0_i32_0 : i32, i32, i32
  }
}

</mosaic_0001>

<bundles_post_ra>
// kernel: tpu_custom_call.1
= control target key start
LH: loop header
LB: loop body
LE: loop exit
PB: predicated region body
PF: predicated region fallthrough
CT: control target
= control target key end

     0   :  { %7 = vsyncpa [#allocation3], 0  ;;  %s172_s0 = inlined_call_operand.vmem [shape: u32[3,128], index: 0, kind: input, shape index: {}]   ;;  %s173_s1 = inlined_call_operand.hbm [shape: s8[2,3,128], index: 1, kind: input, shape index: {}, may-alias: {1,2}]   ;;  %s174_s2 = inlined_call_operand.hbm [shape: s8[2,3,128], index: 2, kind: output, shape index: {}, may-alias: {1,2}]  }
   0x1   :  { %8 = vsyncpa [#allocation4], 0  ;;  %s119_s9 = smov [#allocation2]   ;;  %s71_s13 = scalar_lea.hbm %s173_s1, 32 }
   0x2   :  { %s16_s10 = sshll.u32 %s119_s9, 4  ;;  %p72_p0 = scmp.ne.s32.totalorder %s173_s1, %s71_s13  ;;  %s17_s10 = int_to_ptr.vmem [resolvable:$true] %s16_s10 }
   0x3   :  { %p75_p1 = scmp.lt.u32.totalorder %s71_s13, %s173_s1 }
   0x5   :  { %p77_p2 = pnand %p75_p1, %p72_p0 }
   0x7   :  { %80 = shalt.err (!%p77_p2)
}
   0x8   :  { %s81_s18 = scalar_lea.vmem %s17_s10, 32  ;;  %p86_p4 = scmp.lt.s32.totalorder %s17_s10, %s17_s10 }
   0x9   :  { %p82_p3 = scmp.ne.s32.totalorder %s17_s10, %s81_s18  ;;  %p87_p5 = scmp.lt.s32.totalorder %s81_s18, %s81_s18 }
   0xb   :  { %p88_p6 = por %p87_p5, %p86_p4 }
   0xd   :  { %p89_p7 = pnand %p88_p6, %p82_p3 }
   0xf   :  { %92 = shalt.err (!%p89_p7)
}
  0x10   :  { %s120_s19 = smov 16   ;;  %s121_s20 = smov 1  }
  0x11   :  { %22 = dma.hbm_to_vmem [thread:$0]  %s173_s1, 32, %s17_s10, [#allocation3], %s120_s19, %s120_s19, %s121_s20  }
  0x12   :  { %115 = dma.done.wait [#allocation3], 32  }
  0x13   :  { %116 = vsyncadd [#allocation3], 4294967264  ;;  %v27_v0 = vld [vmem:[%s172_s0] sm:$0x7]  ;;  %v122_v2 = vmov 0   ;;  %vm40_vm1 = vcmask 1040384  }
  0x14   :  { %v28_v1 = vshrl.u32 %v27_v0, 8  ;;  %vm41_vm2 = vsmask.f32 512  ;;  %v30_v5 = vld [vmem:[#allocation2] sm:$0x1]  ;;  %s123_s25 = smov [#allocation5]  }
  0x15   :  { %v31_v7 = vld [vmem:[#allocation2 + $0x1] sm:$0x1]  ;;  %s54_s26 = sshll.u32 %s123_s25, 4  ;;  %vm42_vm3 = vmand %vm40_vm1, %vm41_vm2  ;;  %v43_v8 = vld [vmem:[#allocation5] sm:$0x1]  ;;  %s55_s26 = int_to_ptr.vmem [resolvable:$true] %s54_s26 }
  0x16   :  { %vm29_vm0 = vcmp.ge.u32.totalorder %v28_v1, 838860  ;;  %v46_v9 = vld [vmem:[#allocation5 + $0x1] sm:$0x1]  ;;  %s93_s0 = scalar_lea.vmem %s55_s26, 32  ;;  %p98_p9 = scmp.lt.s32.totalorder %s55_s26, %s55_s26 }
  0x17   :  { %v34_v3 = vsel %vm29_vm0, 1, %v122_v2  ;;  %p94_p8 = scmp.ne.s32.totalorder %s55_s26, %s93_s0  ;;  %p99_p10 = scmp.lt.s32.totalorder %s93_s0, %s93_s0 }
  0x18   :  { %v35_v4 = vpack.c.b16 %v34_v3, %v34_v3 }
  0x19   :  { %p100_p11 = por %p99_p10, %p98_p9 }
  0x1a   :  { %v36_v6 = vpack.c.b8 %v35_v4, %v35_v4 }
  0x1b   :  { %p101_p12 = pnand %p100_p11, %p94_p8 }
  0x1c   :  { %vm37_vm4 = vnez %v36_v6 }
  0x1d   :  { %v38_v10 = vsel %vm37_vm4, %v30_v5, 0  ;;  %v39_v11 = vsel %vm37_vm4, %v31_v7, 0 }
  0x1e   :  { %v44_v12 = vsel %vm42_vm3, %v38_v10, %v43_v8  ;;  %v47_v13 = vsel %vm42_vm3, %v39_v11, %v46_v9 }
  0x1f   :  { %45 = vst [vmem:[#allocation5] sm:$0x1] %v44_v12  ;;  %48 = vst [vmem:[#allocation5 + $0x1] sm:$0x1] %v47_v13 }
  0x20   :  { %104 = shalt.err (!%p101_p12)
}
  0x21   :  { %s105_s28 = scalar_lea.hbm %s174_s2, 32 }
  0x22   :  { %p106_p13 = scmp.ne.s32.totalorder %s174_s2, %s105_s28  ;;  %p109_p0 = scmp.lt.u32.totalorder %s105_s28, %s174_s2 }
  0x24   :  { %p111_p1 = pnand %p109_p0, %p106_p13 }
  0x26   :  { %114 = shalt.err (!%p111_p1)
}
  0x27   :  { %60 = dma.vmem_to_hbm [thread:$0]  %s55_s26, 32, %s174_s2, [#allocation4], %s120_s19, %s120_s19, %s121_s20  }
  0x28   :  { %117 = dma.done.wait [#allocation4], 32  }
  0x29   :  { %118 = vsyncadd [#allocation4], 4294967264 }
  0x2a   :  { %64 = vsyncpa [#allocation3], 1 }
  0x2b   :  { %65 = vsyncpa [#allocation4], 1 }

</bundles_post_ra>
